<compile_context>
chip_gen: v7x
topology: tpu7x:2x2x1
jax: 0.10.0
libtpu: 0.0.40
codegen_flags: <defaults>
</compile_context>

<pallas_src>
import jax
import jax.numpy as jnp
from jax.experimental import pallas as pl
from jax.experimental.pallas import tpu as pltpu


def _vmem_spec():
    return pl.BlockSpec(memory_space=pltpu.MemorySpace.VMEM)


# ----------------------------- fused Pallas kernel --------------------------

def make_fused_kernel(layer_cfgs, vec_rows, head_rows, head_folded,
                      final_linear, final_sigmoid):
    """Whole SAGENet_ray forward pass in one kernel (no grid, no scratch)."""

    def kernel(x_ref, a_ref, w_ref, vec_ref, out_ref):
        a_bf = a_ref[...]          # [N, N] bf16 adjacency, VMEM-resident for all layers
        vecs = vec_ref[...]        # [rows, 128] f32 packed bias/gamma/beta
        h = x_ref[...]             # [N, C] f32 activations, never leave VMEM

        for l, cfg in enumerate(layer_cfgs):
            c_in, c_out = cfg["c_in"], cfg["c_out"]
            w = w_ref[l]                                       # [Kpad, 256] bf16
            # One merged MXU matmul for both SAGEConv projections.
            xw = jnp.dot(h.astype(jnp.bfloat16), w[0:c_in, :],
                         preferred_element_type=jnp.float32)   # [N, 256] f32
            # Lane-aligned split: W_l in lanes [0,128), W_r in lanes [128,256).
            xl = xw[:, 0:c_out]                                # x @ W_l
            xr = xw[:, 128:128 + c_out]                        # x @ W_r
            r_b = vec_rows[l]["bias"]
            bias = vecs[r_b:r_b + 1, 0:c_out]
            # Mean-neighbor aggregation after the projection: A @ (x @ W_l).
            z = (jnp.dot(a_bf, xl.astype(jnp.bfloat16),
                         preferred_element_type=jnp.float32)
                 + xr + bias)
            if cfg["use_bn"]:
                # BatchNorm1d, training-mode batch stats, one-pass sum/sumsq
                # with a fused affine (alpha, beta - mean*alpha).
                inv_n = 1.0 / z.shape[0]
                s1 = jnp.sum(z, axis=0, keepdims=True)
                s2 = jnp.sum(z * z, axis=0, keepdims=True)
                mean = s1 * inv_n
                var = s2 * inv_n - mean * mean
                r_g = vec_rows[l]["gamma"]
                r_bt = vec_rows[l]["beta"]
                gamma = vecs[r_g:r_g + 1, 0:c_out]
                beta = vecs[r_bt:r_bt + 1, 0:c_out]
                alpha = gamma * jax.lax.rsqrt(var + 1e-5)
                z = z * alpha + (beta - mean * alpha)
            if cfg["activation"] == "relu":
                z = jnp.maximum(z, 0.0)
            h = z

        # Head: normally folded host-side into the last layer's weights.
        if final_linear and not head_folded:
            hw = vecs[head_rows[0]:head_rows[0] + 1, 0:1]
            hb = vecs[head_rows[1]:head_rows[1] + 1, 0:1]
            h = h * hw + hb
        if final_sigmoid:
            h = jax.nn.sigmoid(h)
        out_ref[...] = h.astype(out_ref.dtype)

    return kernel


def sagenet_forward(x, a, wpack, vecpack, layer_cfgs, vec_rows, head_rows,
                    head_folded, final_linear, final_sigmoid):
    n = x.shape[0]
    c_last = layer_cfgs[-1]["c_out"]
    kernel = make_fused_kernel(layer_cfgs, vec_rows, head_rows, head_folded,
                               final_linear, final_sigmoid)
    return pl.pallas_call(
        kernel,
        out_shape=jax.ShapeDtypeStruct((n, c_last), jnp.float32),
        in_specs=[_vmem_spec()] * 4,
        out_specs=_vmem_spec(),
    )(x, a, wpack, vecpack)


# ----------------------------- host-side packing ----------------------------

def _pad_row(v, width):
    v = jnp.reshape(v, (-1,))
    return jnp.zeros((width,), jnp.float32).at[:v.shape[0]].set(v)


def pack_params(params, layer_cfgs, final_linear):
    """Pack all layer weights into one bf16 array and all small vectors into
    one f32 array.  Folds the Linear(1,1) head into the last layer when valid."""
    num_layers = len(layer_cfgs)
    last = layer_cfgs[-1]
    head_folded = (final_linear and not last["use_bn"]
                   and last["activation"] in (None, "None")
                   and last["c_out"] == 1)

    max_cin = max(cfg["c_in"] for cfg in layer_cfgs)
    kpad = max(8, ((max_cin + 7) // 8) * 8)
    wpack = jnp.zeros((num_layers, kpad, 256), jnp.float32)

    hw = params["head_w"][0, 0]
    hb = params["head_b"][0, 0]

    vec_rows, vec_list = [], []
    row = 0
    for i, (cfg, lp) in enumerate(zip(layer_cfgs, params["layers"])):
        c_in, c_out = cfg["c_in"], cfg["c_out"]
        wl, wr, b = lp["wl"], lp["wr"], lp["bl"]
        if head_folded and i == num_layers - 1:
            wl = wl * hw
            wr = wr * hw
            b = b * hw + hb
        wpack = wpack.at[i, :c_in, 0:c_out].set(wl)
        wpack = wpack.at[i, :c_in, 128:128 + c_out].set(wr)
        rows = {"bias": row}
        vec_list.append(_pad_row(b, 128))
        row += 1
        if cfg["use_bn"]:
            rows["gamma"] = row
            vec_list.append(_pad_row(lp["gamma"], 128))
            row += 1
            rows["beta"] = row
            vec_list.append(_pad_row(lp["beta"], 128))
            row += 1
        vec_rows.append(rows)

    head_rows = None
    if final_linear and not head_folded:
        head_rows = (row, row + 1)
        vec_list.append(_pad_row(params["head_w"], 128))
        vec_list.append(_pad_row(params["head_b"], 128))
        row += 2

    nrows = max(8, ((row + 7) // 8) * 8)
    vecpack = jnp.zeros((nrows, 128), jnp.float32)
    for r, v in enumerate(vec_list):
        vecpack = vecpack.at[r].set(v)

    return wpack.astype(jnp.bfloat16), vecpack, vec_rows, head_rows, head_folded


# ----------------------------- plain-JAX glue -------------------------------

def build_mean_adj(edge_index, num_nodes):
    """Dense row-normalized adjacency (bf16) for PyG scatter-mean aggregation."""
    src, dst = edge_index[0], edge_index[1]
    a = jnp.zeros((num_nodes, num_nodes), jnp.float32).at[dst, src].add(1.0)
    deg = jnp.maximum(jnp.sum(a, axis=1, keepdims=True), 1.0)
    return (a / deg).astype(jnp.bfloat16)


def init_params(key, num_layers, num_channels, final_linear_layer):
    params = {"layers": []}
    for i in range(num_layers):
        c_in, c_out = num_channels[i], num_channels[i + 1]
        key, k1, k2, k3 = jax.random.split(key, 4)
        scale = 1.0 / jnp.sqrt(jnp.float32(c_in))
        params["layers"].append({
            "wl": jax.random.normal(k1, (c_in, c_out), jnp.float32) * scale,
            "bl": jax.random.normal(k2, (1, c_out), jnp.float32) * 0.01,
            "wr": jax.random.normal(k3, (c_in, c_out), jnp.float32) * scale,
            "gamma": jnp.ones((1, c_out), jnp.float32),
            "beta": jnp.zeros((1, c_out), jnp.float32),
        })
    key, kw, kb = jax.random.split(key, 3)
    if final_linear_layer:
        params["head_w"] = jax.random.normal(kw, (1, 1), jnp.float32)
        params["head_b"] = jax.random.normal(kb, (1, 1), jnp.float32) * 0.01
    else:
        params["head_w"] = jnp.ones((1, 1), jnp.float32)
        params["head_b"] = jnp.zeros((1, 1), jnp.float32)
    return params


def _bn_onepass(z, gamma, beta):
    inv_n = 1.0 / z.shape[0]
    s1 = jnp.sum(z, axis=0, keepdims=True)
    s2 = jnp.sum(z * z, axis=0, keepdims=True)
    mean = s1 * inv_n
    var = s2 * inv_n - mean * mean
    alpha = gamma * jax.lax.rsqrt(var + 1e-5)
    return z * alpha + (beta - mean * alpha)


def reference_forward_f32(params, x, a, layer_cfgs, final_linear, final_sigmoid):
    """Pure-f32 reference with PyTorch-module semantics (training-mode BN)."""
    a32 = a.astype(jnp.float32)
    h = x
    for cfg, lp in zip(layer_cfgs, params["layers"]):
        z = (a32 @ h) @ lp["wl"] + h @ lp["wr"] + lp["bl"]
        if cfg["use_bn"]:
            mean = jnp.mean(z, axis=0, keepdims=True)
            var = jnp.mean((z - mean) ** 2, axis=0, keepdims=True)
            z = (z - mean) * jax.lax.rsqrt(var + 1e-5)
            z = z * lp["gamma"] + lp["beta"]
        if cfg["activation"] == "relu":
            z = jnp.maximum(z, 0.0)
        h = z
    if final_linear:
        h = h * params["head_w"] + params["head_b"]
    if final_sigmoid:
        h = jax.nn.sigmoid(h)
    return h


def reference_forward_mixed(x, a, wpack, vecpack, layer_cfgs, vec_rows,
                            head_rows, head_folded, final_linear, final_sigmoid):
    """Mirrors the kernel's packed weights / bf16-MXU / f32-accumulate numerics."""
    h = x
    for l, cfg in enumerate(layer_cfgs):
        c_in, c_out = cfg["c_in"], cfg["c_out"]
        w = wpack[l, 0:c_in, :]
        xw = jnp.dot(h.astype(jnp.bfloat16), w, preferred_element_type=jnp.float32)
        xl, xr = xw[:, 0:c_out], xw[:, 128:128 + c_out]
        r_b = vec_rows[l]["bias"]
        bias = vecpack[r_b:r_b + 1, 0:c_out]
        z = (jnp.dot(a, xl.astype(jnp.bfloat16), preferred_element_type=jnp.float32)
             + xr + bias)
        if cfg["use_bn"]:
            r_g, r_bt = vec_rows[l]["gamma"], vec_rows[l]["beta"]
            z = _bn_onepass(z, vecpack[r_g:r_g + 1, 0:c_out],
                            vecpack[r_bt:r_bt + 1, 0:c_out])
        if cfg["activation"] == "relu":
            z = jnp.maximum(z, 0.0)
        h = z
    if final_linear and not head_folded:
        h = h * vecpack[head_rows[0]:head_rows[0] + 1, 0:1] \
              + vecpack[head_rows[1]:head_rows[1] + 1, 0:1]
    if final_sigmoid:
        h = jax.nn.sigmoid(h)
    return h


# --------------------------------- main --------------------------------------

if __name__ == "__main__":
    key = jax.random.PRNGKey(0)

    # module config (SAGENet_ray __init__ args)
    N = 16                                   # number of graph nodes
    num_layers = 3
    num_channels = [4, 32, 16, 1]
    activation = ["relu", "relu", "None"]
    batch_norm_index = [True, False, False]
    final_linear_layer = True
    final_sigmoid_layer = True

    if final_linear_layer:
        # Linear(1,1) head applied per-element; requires last channel dim == 1.
        assert num_channels[-1] == 1

    layer_cfgs = [{"c_in": num_channels[i], "c_out": num_channels[i + 1],
                   "use_bn": batch_norm_index[i], "activation": activation[i]}
                  for i in range(num_layers)]

    k_x, k_p = jax.random.split(key)
    x = jax.random.normal(k_x, (N, num_channels[0]), jnp.float32)    # data.x

    # deterministic edge_index: ring + chord edges (src row 0, dst row 1)
    src, dst = [], []
    for i in range(N):
        src += [i, i]
        dst += [(i + 1) % N, (i + 3) % N]
    edge_index = jnp.array([src, dst], dtype=jnp.int32)              # data.edge_index
    a = build_mean_adj(edge_index, N)

    params = init_params(k_p, num_layers, num_channels, final_linear_layer)
    wpack, vecpack, vec_rows, head_rows, head_folded = pack_params(
        params, layer_cfgs, final_linear_layer)

    out = sagenet_forward(x, a, wpack, vecpack, layer_cfgs, vec_rows, head_rows,
                          head_folded, final_linear_layer, final_sigmoid_layer)
    out = jax.block_until_ready(out)
    assert out.shape == (N, 1)

    # Tight check: kernel vs XLA with identical packed-weight mixed-precision math.
    ref_mixed = reference_forward_mixed(x, a, wpack, vecpack, layer_cfgs, vec_rows,
                                        head_rows, head_folded,
                                        final_linear_layer, final_sigmoid_layer)
    assert jnp.allclose(out, ref_mixed, atol=5e-3, rtol=5e-3), \
        "mismatch vs mixed-precision reference"

    # Loose check: kernel vs pure-f32 module semantics (bf16 MXU operands).
    ref_f32 = reference_forward_f32(params, x, a, layer_cfgs,
                                    final_linear_layer, final_sigmoid_layer)
    assert jnp.allclose(out, ref_f32, atol=5e-2, rtol=5e-2), \
        "mismatch vs f32 reference"

    print("KERNEL_OK")
</pallas_src>

<mosaic_0001>
module attributes {stable_mosaic.version = 11 : i64} {
  func.func @kernel(%arg0: memref<16x4xf32, #tpu.memory_space<vmem>>, %arg1: memref<16x16xbf16, #tpu.memory_space<vmem>>, %arg2: memref<3x32x256xbf16, #tpu.memory_space<vmem>>, %arg3: memref<8x128xf32, #tpu.memory_space<vmem>>, %arg4: memref<16x1xf32, #tpu.memory_space<vmem>>) attributes {dimension_semantics = [], scalar_prefetch = 0 : i64, scratch_operands = 0 : i64, tpu.core_type = #tpu.core_type<tc>} {
    %c0 = arith.constant 0 : index
    %c0_0 = arith.constant 0 : index
    %0 = vector.load %arg1[%c0, %c0_0] : memref<16x16xbf16, #tpu.memory_space<vmem>>, vector<16x16xbf16>
    %c0_1 = arith.constant 0 : index
    %c0_2 = arith.constant 0 : index
    %1 = vector.load %arg3[%c0_1, %c0_2] : memref<8x128xf32, #tpu.memory_space<vmem>>, vector<8x128xf32>
    %c0_3 = arith.constant 0 : index
    %c0_4 = arith.constant 0 : index
    %2 = vector.load %arg0[%c0_3, %c0_4] : memref<16x4xf32, #tpu.memory_space<vmem>>, vector<16x4xf32>
    %c0_5 = arith.constant 0 : index
    %c0_6 = arith.constant 0 : index
    %c0_7 = arith.constant 0 : index
    %3 = vector.load %arg2[%c0_5, %c0_6, %c0_7] : memref<3x32x256xbf16, #tpu.memory_space<vmem>>, vector<1x32x256xbf16>
    %4 = vector.shape_cast %3 : vector<1x32x256xbf16> to vector<32x256xbf16>
    %5 = arith.truncf %2 : vector<16x4xf32> to vector<16x4xbf16>
    %6 = vector.extract_strided_slice %4 {offsets = [0, 0], sizes = [4, 256], strides = [1, 1]} : vector<32x256xbf16> to vector<4x256xbf16>
    %cst = arith.constant dense<0.000000e+00> : vector<16x256xf32>
    %7 = tpu.matmul %5, %6, %cst {dimension_numbers = #tpu.dot_dimension_numbers<[1], [0], [0], [1], [0, 0, 1, 1], [], []>} : vector<16x4xbf16>, vector<4x256xbf16>, vector<16x256xf32> -> vector<16x256xf32>
    %8 = vector.extract_strided_slice %7 {offsets = [0, 0], sizes = [16, 32], strides = [1, 1]} : vector<16x256xf32> to vector<16x32xf32>
    %9 = vector.extract_strided_slice %7 {offsets = [0, 128], sizes = [16, 32], strides = [1, 1]} : vector<16x256xf32> to vector<16x32xf32>
    %10 = vector.extract_strided_slice %1 {offsets = [0, 0], sizes = [1, 32], strides = [1, 1]} : vector<8x128xf32> to vector<1x32xf32>
    %11 = arith.truncf %8 : vector<16x32xf32> to vector<16x32xbf16>
    %cst_8 = arith.constant dense<0.000000e+00> : vector<16x32xf32>
    %12 = tpu.matmul %0, %11, %cst_8 {dimension_numbers = #tpu.dot_dimension_numbers<[1], [0], [0], [1], [0, 0, 1, 1], [], []>} : vector<16x16xbf16>, vector<16x32xbf16>, vector<16x32xf32> -> vector<16x32xf32>
    %13 = arith.addf %12, %9 : vector<16x32xf32>
    %14 = vector.broadcast %10 : vector<1x32xf32> to vector<16x32xf32>
    %15 = arith.addf %13, %14 : vector<16x32xf32>
    %cst_9 = arith.constant dense<0.000000e+00> : vector<32xf32>
    %16 = vector.multi_reduction <add>, %15, %cst_9 [0] : vector<16x32xf32> to vector<32xf32>
    %17 = vector.shape_cast %16 : vector<32xf32> to vector<1x32xf32>
    %18 = arith.mulf %15, %15 : vector<16x32xf32>
    %cst_10 = arith.constant dense<0.000000e+00> : vector<32xf32>
    %19 = vector.multi_reduction <add>, %18, %cst_10 [0] : vector<16x32xf32> to vector<32xf32>
    %20 = vector.shape_cast %19 : vector<32xf32> to vector<1x32xf32>
    %cst_11 = arith.constant 6.250000e-02 : f32
    %21 = vector.broadcast %cst_11 : f32 to vector<1x32xf32>
    %22 = arith.mulf %17, %21 : vector<1x32xf32>
    %cst_12 = arith.constant 6.250000e-02 : f32
    %23 = vector.broadcast %cst_12 : f32 to vector<1x32xf32>
    %24 = arith.mulf %20, %23 : vector<1x32xf32>
    %25 = arith.mulf %22, %22 : vector<1x32xf32>
    %26 = arith.subf %24, %25 : vector<1x32xf32>
    %27 = vector.extract_strided_slice %1 {offsets = [1, 0], sizes = [1, 32], strides = [1, 1]} : vector<8x128xf32> to vector<1x32xf32>
    %28 = vector.extract_strided_slice %1 {offsets = [2, 0], sizes = [1, 32], strides = [1, 1]} : vector<8x128xf32> to vector<1x32xf32>
    %cst_13 = arith.constant 9.99999974E-6 : f32
    %29 = vector.broadcast %cst_13 : f32 to vector<1x32xf32>
    %30 = arith.addf %26, %29 : vector<1x32xf32>
    %31 = math.rsqrt %30 : vector<1x32xf32>
    %32 = arith.mulf %27, %31 : vector<1x32xf32>
    %33 = vector.broadcast %32 : vector<1x32xf32> to vector<16x32xf32>
    %34 = arith.mulf %15, %33 : vector<16x32xf32>
    %35 = arith.mulf %22, %32 : vector<1x32xf32>
    %36 = arith.subf %28, %35 : vector<1x32xf32>
    %37 = vector.broadcast %36 : vector<1x32xf32> to vector<16x32xf32>
    %38 = arith.addf %34, %37 : vector<16x32xf32>
    %cst_14 = arith.constant 0.000000e+00 : f32
    %39 = vector.broadcast %cst_14 : f32 to vector<16x32xf32>
    %40 = arith.maximumf %38, %39 : vector<16x32xf32>
    %c1 = arith.constant 1 : index
    %c0_15 = arith.constant 0 : index
    %c0_16 = arith.constant 0 : index
    %41 = vector.load %arg2[%c1, %c0_15, %c0_16] : memref<3x32x256xbf16, #tpu.memory_space<vmem>>, vector<1x32x256xbf16>
    %42 = vector.shape_cast %41 : vector<1x32x256xbf16> to vector<32x256xbf16>
    %43 = arith.truncf %40 : vector<16x32xf32> to vector<16x32xbf16>
    %cst_17 = arith.constant dense<0.000000e+00> : vector<16x256xf32>
    %44 = tpu.matmul %43, %42, %cst_17 {dimension_numbers = #tpu.dot_dimension_numbers<[1], [0], [0], [1], [0, 0, 1, 1], [], []>} : vector<16x32xbf16>, vector<32x256xbf16>, vector<16x256xf32> -> vector<16x256xf32>
    %45 = vector.extract_strided_slice %44 {offsets = [0, 0], sizes = [16, 16], strides = [1, 1]} : vector<16x256xf32> to vector<16x16xf32>
    %46 = vector.extract_strided_slice %44 {offsets = [0, 128], sizes = [16, 16], strides = [1, 1]} : vector<16x256xf32> to vector<16x16xf32>
    %47 = vector.extract_strided_slice %1 {offsets = [3, 0], sizes = [1, 16], strides = [1, 1]} : vector<8x128xf32> to vector<1x16xf32>
    %48 = arith.truncf %45 : vector<16x16xf32> to vector<16x16xbf16>
    %cst_18 = arith.constant dense<0.000000e+00> : vector<16x16xf32>
    %49 = tpu.matmul %0, %48, %cst_18 {dimension_numbers = #tpu.dot_dimension_numbers<[1], [0], [0], [1], [0, 0, 1, 1], [], []>} : vector<16x16xbf16>, vector<16x16xbf16>, vector<16x16xf32> -> vector<16x16xf32>
    %50 = arith.addf %49, %46 : vector<16x16xf32>
    %51 = vector.broadcast %47 : vector<1x16xf32> to vector<16x16xf32>
    %52 = arith.addf %50, %51 : vector<16x16xf32>
    %cst_19 = arith.constant 0.000000e+00 : f32
    %53 = vector.broadcast %cst_19 : f32 to vector<16x16xf32>
    %54 = arith.maximumf %52, %53 : vector<16x16xf32>
    %c2 = arith.constant 2 : index
    %c0_20 = arith.constant 0 : index
    %c0_21 = arith.constant 0 : index
    %55 = vector.load %arg2[%c2, %c0_20, %c0_21] : memref<3x32x256xbf16, #tpu.memory_space<vmem>>, vector<1x32x256xbf16>
    %56 = vector.shape_cast %55 : vector<1x32x256xbf16> to vector<32x256xbf16>
    %57 = arith.truncf %54 : vector<16x16xf32> to vector<16x16xbf16>
    %58 = vector.extract_strided_slice %56 {offsets = [0, 0], sizes = [16, 256], strides = [1, 1]} : vector<32x256xbf16> to vector<16x256xbf16>
    %cst_22 = arith.constant dense<0.000000e+00> : vector<16x256xf32>
    %59 = tpu.matmul %57, %58, %cst_22 {dimension_numbers = #tpu.dot_dimension_numbers<[1], [0], [0], [1], [0, 0, 1, 1], [], []>} : vector<16x16xbf16>, vector<16x256xbf16>, vector<16x256xf32> -> vector<16x256xf32>
    %60 = vector.extract_strided_slice %59 {offsets = [0, 0], sizes = [16, 1], strides = [1, 1]} : vector<16x256xf32> to vector<16x1xf32>
    %61 = vector.extract_strided_slice %59 {offsets = [0, 128], sizes = [16, 1], strides = [1, 1]} : vector<16x256xf32> to vector<16x1xf32>
    %62 = vector.extract_strided_slice %1 {offsets = [4, 0], sizes = [1, 1], strides = [1, 1]} : vector<8x128xf32> to vector<1x1xf32>
    %63 = arith.truncf %60 : vector<16x1xf32> to vector<16x1xbf16>
    %cst_23 = arith.constant dense<0.000000e+00> : vector<16x1xf32>
    %64 = tpu.matmul %0, %63, %cst_23 {dimension_numbers = #tpu.dot_dimension_numbers<[1], [0], [0], [1], [0, 0, 1, 1], [], []>} : vector<16x16xbf16>, vector<16x1xbf16>, vector<16x1xf32> -> vector<16x1xf32>
    %65 = arith.addf %64, %61 : vector<16x1xf32>
    %66 = vector.broadcast %62 : vector<1x1xf32> to vector<16x1xf32>
    %67 = arith.addf %65, %66 : vector<16x1xf32>
    %68 = arith.negf %67 : vector<16x1xf32>
    %69 = math.exp %68 : vector<16x1xf32>
    %cst_24 = arith.constant 1.000000e+00 : f32
    %70 = vector.broadcast %cst_24 : f32 to vector<16x1xf32>
    %71 = arith.addf %70, %69 : vector<16x1xf32>
    %72 = arith.divf %70, %71 : vector<16x1xf32>
    %c0_25 = arith.constant 0 : index
    %c0_26 = arith.constant 0 : index
    %73 = vector.load %arg4[%c0_25, %c0_26] : memref<16x1xf32, #tpu.memory_space<vmem>>, vector<16x1xf32>
    tpu.vector_store %arg4[%c0_25, %c0_26], %72 {strides = array<i32>} : memref<16x1xf32, #tpu.memory_space<vmem>>, vector<16x1xf32>,
    return
  }
}

</mosaic_0001>

<bundles_post_ra>
// kernel: tpu_custom_call.1
= control target key start
LH: loop header
LB: loop body
LE: loop exit
PB: predicated region body
PF: predicated region fallthrough
CT: control target
= control target key end

     0   :  { %9 = vsyncpa [#allocation3], 0  ;;  %s546_s15 = smov [#allocation2]   ;;  %s647_s0 = inlined_call_operand.vmem [shape: f32[16,4], index: 0, kind: input, shape index: {}]   ;;  %s648_s1 = inlined_call_operand.vmem [shape: bf16[16,16], index: 1, kind: input, shape index: {}]   ;;  %s649_s2 = inlined_call_operand.hbm [shape: bf16[3,32,256], index: 2, kind: input, shape index: {}]   ;;  %s650_s3 = inlined_call_operand.vmem [shape: f32[8,128], index: 3, kind: input, shape index: {}]   ;;  %s651_s4 = inlined_call_operand.vmem [shape: f32[16,1], index: 4, kind: output, shape index: {}]  }
   0x1   :  { %s19_s16 = sshll.u32 %s546_s15, 4  ;;  %s522_s19 = scalar_lea.hbm %s649_s2, 1536  ;;  %s20_s16 = int_to_ptr.vmem [resolvable:$true] %s19_s16 }
   0x2   :  { %p523_p0 = scmp.ne.s32.totalorder %s649_s2, %s522_s19  ;;  %p526_p1 = scmp.lt.u32.totalorder %s522_s19, %s649_s2 }
   0x4   :  { %p528_p2 = pnand %p526_p1, %p523_p0 }
   0x6   :  { %531 = shalt.err (!%p528_p2)
}
   0x7   :  { %s532_s24 = scalar_lea.vmem %s20_s16, 1536  ;;  %p537_p4 = scmp.lt.s32.totalorder %s20_s16, %s20_s16 }
   0x8   :  { %p533_p3 = scmp.ne.s32.totalorder %s20_s16, %s532_s24  ;;  %p538_p5 = scmp.lt.s32.totalorder %s532_s24, %s532_s24 }
   0xa   :  { %p539_p6 = por %p538_p5, %p537_p4 }
   0xc   :  { %p540_p7 = pnand %p539_p6, %p533_p3 }
   0xe   :  { %543 = shalt.err (!%p540_p7)
}
   0xf   :  { %s547_s25 = smov 128   ;;  %s548_s26 = smov 8  }
  0x10   :  { %25 = dma.hbm_to_vmem [thread:$0]  %s649_s2, 1536, %s20_s16, [#allocation3], %s547_s25, %s547_s25, %s548_s26  }
  0x11   :  { %544 = dma.done.wait [#allocation3], 1536  }
  0x12   :  { %545 = vsyncadd [#allocation3], 4294965760  ;;  %v549_v0 = vmov 0   ;;  %v37_v1 = vld [vmem:[#allocation2] sm:$0xff]  ;;  %vm48_vm0 = vcmask 1041408   ;;  %v36_v3 = vld [vmem:[%s647_s0 + $0x8] sm:$0xff]  ;;  %v149_v19 = vlaneseq }
  0x13   :  { %87 = vmatprep.mubr.bf16.mxu0 %v549_v0  ;;  %v35_v2 = vld [vmem:[%s647_s0] sm:$0xff]  ;;  %v453_v4 = vcombine.high %v37_v1, %v37_v1  ;;  %v452_v5 = vcombine.low %v37_v1, %v37_v1  ;;  %vm44_vm1 = vcmask 31744   ;;  %v550_v8 = vmov 0.0   ;;  %v508_v17 = vld [vmem:[#allocation2 + $0x34] ss:$8 sps:$4 sm:$0xff]  }
  0x14   :  { %v38_v7 = vpack.c.bf16 %v36_v3, %v35_v2  ;;  %476 = vmatprep.subr.bf16.mxu1 %v550_v8  ;;  %vm551_vm2 = vmmov 0   ;;  %v603_v14 = vld [vmem:[%s648_s1] sm:$0xff]   ;;  %vm104_vm3 = vcmask 130048   ;;  %v506_v18 = vld [vmem:[#allocation2 + $0x30] ss:$8 sps:$4 sm:$0xff]   ;;  %v610_v20 = vshrl.u32 %v149_v19, 7 }
  0x15   :  { %454 = vmatprep.subr.msk.bf16.mxu0 %vm48_vm0, %v453_v4  ;;  %v50_v6 = vsel %vm48_vm0, %v452_v5, 0  ;;  %478 = vmatprep.mubr.msk.bf16.mxu1 %vm551_vm2, %v550_v8  ;;  %v503_v15 = vld [vmem:[#allocation2 + $0x20] ss:$8 sps:$4 sm:$0xff]   ;;  %v505_v16 = vld [vmem:[#allocation2 + $0x24] ss:$8 sps:$4 sm:$0xff]   ;;  %vm155_vm4 = vcmask 261120  }
  0x16   :  { %56 = vmatpush1.bf16.msra.mxu0 %v50_v6  ;;  %v151_v21 = vsub.s32 0, %v610_v20  ;;  %v616_v22 = vld [vmem:[%s650_s3] sm:$0xff]  ;;  %v185_v57 = vsub.s32 1, %v610_v20  ;;  %v196_v2 = vsub.s32 2, %v610_v20  ;;  %vm444_vm5 = vcmask 7168  }
  0x17   :  { %231 = vmatprep.subr.bf16.mxu0 %v505_v16 }
  0x18   :  { %v152_v23 = vrot.slane %v616_v22, %v151_v21 }
  0x19   :  { %455 = vmatmul.mubr.msk.bf16.vlgmr.msra.gmra.mrb[0].mxu0 %vm44_vm1, %v38_v7 }
  0x1a   :  { %263 = vmatprep.mubr.bf16.mxu0 %v549_v0  ;;  %232 = vmatpush1.bf16.msra.mxu0 %v503_v15 }
  0x1b   :  { %233 = vmatprep.subr.bf16.mxu0 %v508_v17  ;;  %v511_v17 = vld [vmem:[#allocation2 + $0x44] ss:$8 sps:$4 sm:$0xff]  }
  0x1e   :  { %234 = vmatpush1.bf16.msra.mxu0 %v506_v18  ;;  %v509_v18 = vld [vmem:[#allocation2 + $0x40] ss:$8 sps:$4 sm:$0xff]  }
  0x1f   :  { %341 = vmatprep.subr.bf16.mxu0 %v511_v17 }
  0xec   :  { %v89_v9 = vpop.f32.mrb[0].mxu0 }
  0xed   :  { %v91_v10 = vpop.f32.mrb[1].mxu0 }
  0xee   :  { %v93_v11 = vpop.f32.mrb[2].mxu0 }
  0xef   :  { %v98_v12 = vpack.c.bf16 %v93_v11, %v89_v9  ;;  %v95_v13 = vpop.f32.mrb[3].mxu0 }
  0xf1   :  { %477 = vmatpush3.bf16.msra.mxu1 %v98_v12 }
  0xf2   :  { %482 = vmatprep.subr.bf16.mxu1 %v550_v8 }
  0xf4   :  { %479 = vmatmul.mubr.msk.bf16.vlgmr.msra.gmra.mrb[0].mxu1 %vm104_vm3, %v603_v14 }
  0xf5   :  { %484 = vmatprep.mubr.msk.bf16.mxu1 %vm551_vm2, %v550_v8 }
 0x1c7   :  { %v142_v24 = vpop.f32.mrb[0].mxu1 }
 0x1c8   :  { %v143_v25 = vadd.f32 %v142_v24, %v91_v10  ;;  %v480_v26 = vpop.f32.mrb[1].mxu1 }
 0x1c9   :  { %v145_v27 = vpop.f32.mrb[2].mxu1 }
 0x1ca   :  { %v153_v28 = vadd.f32 %v152_v23, %v143_v25  ;;  %v146_v29 = vadd.f32 %v145_v27, %v95_v13  ;;  %v481_v30 = vpop.f32.mrb[3].mxu1 }
 0x1cc   :  { %v165_v31 = vmul.f32 %v153_v28, %v153_v28  ;;  %v154_v32 = vadd.f32 %v152_v23, %v146_v29  ;;  %v156_v34 = vsel %vm155_vm4, %v153_v28, 0.0 }
 0x1ce   :  { %v166_v33 = vmul.f32 %v154_v32, %v154_v32  ;;  %v157_v35 = vsel %vm155_vm4, %v154_v32, 0.0  ;;  %v167_v37 = vsel %vm155_vm4, %v165_v31, 0.0 }
 0x1cf   :  { %v158_v36 = vadd.f32 %v157_v35, %v156_v34 }
 0x1d0   :  { %v168_v38 = vsel %vm155_vm4, %v166_v33, 0.0 }
 0x1d1   :  { %v159_v39 = vrot.slane %v158_v36, 4  ;;  %v169_v40 = vadd.f32 %v168_v38, %v167_v37  ;;  %v428_v37 = vsub.s32 4, %v610_v20 }
 0x1d3   :  { %v160_v41 = vadd.f32 %v159_v39, %v158_v36  ;;  %v170_v42 = vrot.slane %v169_v40, 4  ;;  %v429_v38 = vrot.slane %v616_v22, %v428_v37 }
 0x1d5   :  { %v161_v43 = vrot.slane %v160_v41, 2  ;;  %v171_v44 = vadd.f32 %v170_v42, %v169_v40 }
 0x1d7   :  { %v162_v45 = vadd.f32 %v161_v43, %v160_v41  ;;  %v172_v46 = vrot.slane %v171_v44, 2 }
 0x1d9   :  { %v163_v47 = vrot.slane %v162_v45, 1  ;;  %v173_v48 = vadd.f32 %v172_v46, %v171_v44 }
 0x1db   :  { %v164_v49 = vadd.f32 %v163_v47, %v162_v45  ;;  %v174_v50 = vrot.slane %v173_v48, 1 }
 0x1dd   :  { %v175_v51 = vadd.f32 %v174_v50, %v173_v48  ;;  %v176_v52 = vmul.f32 0.0625, %v164_v49 }
 0x1df   :  { %v177_v53 = vmul.f32 0.0625, %v175_v51  ;;  %v178_v54 = vmul.f32 %v176_v52, %v176_v52 }
 0x1e1   :  { %v179_v55 = vsub.f32 %v177_v53, %v178_v54 }
 0x1e3   :  { %v180_v56 = vadd.f32 1e-05, %v179_v55 }
 0x1e5   :  { %512 = vrsqrt.f32 %v180_v56 }
 0x1ef   :  { %v513_v58 = vpop.eup %512 }
 0x1f0   :  { %v182_v59 = vmul.f32 %v513_v58, %v616_v22 }
 0x1f2   :  { %v186_v60 = vrot.slane %v182_v59, %v185_v57  ;;  %v189_v61 = vmul.f32 %v182_v59, %v176_v52 }
 0x1f4   :  { %v187_v62 = vmul.f32 %v186_v60, %v153_v28  ;;  %v188_v63 = vmul.f32 %v186_v60, %v154_v32  ;;  %v191_v1 = vrot.slane %v189_v61, 7 }
 0x1f6   :  { %v193_v3 = vsub.f32 %v616_v22, %v191_v1 }
 0x1f8   :  { %v197_v4 = vrot.slane %v193_v3, %v196_v2 }
 0x1fa   :  { %v198_v5 = vadd.f32 %v197_v4, %v187_v62  ;;  %v199_v6 = vadd.f32 %v197_v4, %v188_v63 }
 0x1fc   :  { %v200_v7 = vmax.f32 %v198_v5, 0.0  ;;  %v201_v9 = vmax.f32 %v199_v6, 0.0 }
 0x1fe   :  { %v207_v10 = vpack.c.bf16 %v201_v9, %v200_v7 }
 0x200   :  { %462 = vmatmul.mubr.msk.bf16.vlgmr.msra.gmra.mrb[4].mxu0 %vm155_vm4, %v207_v10 }
 0x201   :  { %373 = vmatprep.mubr.bf16.mxu0 %v549_v0  ;;  %342 = vmatpush1.bf16.msra.mxu0 %v509_v18  ;;  %v318_v0 = vsub.s32 3, %v610_v20 }
 0x203   :  { %v319_v19 = vrot.slane %v616_v22, %v318_v0 }
 0x2d3   :  { %v265_v11 = vpop.f32.mrb[4].mxu0 }
 0x2d4   :  { %v267_v12 = vpop.f32.mrb[5].mxu0 }
 0x2d5   :  { %v269_v13 = vpop.f32.mrb[6].mxu0 }
 0x2d6   :  { %v274_v15 = vpack.c.bf16 %v269_v13, %v265_v11  ;;  %v271_v16 = vpop.f32.mrb[7].mxu0 }
 0x2d8   :  { %483 = vmatpush3.bf16.msra.mxu1 %v274_v15 }
 0x2d9   :  { %488 = vmatprep.subr.bf16.mxu1 %v550_v8 }
 0x2db   :  { %485 = vmatmul.mubr.msk.bf16.vlgmr.msra.gmra.mrb[4].mxu1 %vm104_vm3, %v603_v14 }
 0x2dc   :  { %490 = vmatprep.mubr.msk.bf16.mxu1 %vm551_vm2, %v550_v8 }
 0x3ae   :  { %v309_v21 = vpop.f32.mrb[4].mxu1 }
 0x3af   :  { %v310_v23 = vadd.f32 %v309_v21, %v267_v12  ;;  %v486_v24 = vpop.f32.mrb[5].mxu1 }
 0x3b0   :  { %v312_v25 = vpop.f32.mrb[6].mxu1 }
 0x3b1   :  { %v320_v26 = vadd.f32 %v319_v19, %v310_v23  ;;  %v313_v27 = vadd.f32 %v312_v25, %v271_v16  ;;  %v487_v28 = vpop.f32.mrb[7].mxu1 }
 0x3b3   :  { %v321_v29 = vadd.f32 %v319_v19, %v313_v27  ;;  %v322_v30 = vmax.f32 %v320_v26, 0.0 }
 0x3b5   :  { %v323_v31 = vmax.f32 %v321_v29, 0.0 }
 0x3b7   :  { %v327_v32 = vpack.c.bf16 %v323_v31, %v322_v30 }
 0x3b9   :  { %466 = vmatmul.mubr.msk.bf16.vlgmr.msra.gmra.mrb[8].mxu0 %vm104_vm3, %v327_v32 }
 0x48c   :  { %v375_v8 = vpop.f32.mrb[8].mxu0 }
 0x48d   :  { %v377_v33 = vpop.f32.mrb[9].mxu0 }
 0x48e   :  { %v379_v34 = vpop.f32.mrb[10].mxu0 }
 0x48f   :  { %v384_v35 = vpack.c.bf16 %v379_v34, %v375_v8  ;;  %v381_v36 = vpop.f32.mrb[11].mxu0 }
 0x491   :  { %489 = vmatpush3.bf16.msra.mxu1 %v384_v35 }
 0x494   :  { %491 = vmatmul.mubr.msk.bf16.vlgmr.msra.gmra.mrb[8].mxu1 %vm104_vm3, %v603_v14 }
 0x567   :  { %v419_v39 = vpop.f32.mrb[8].mxu1 }
 0x568   :  { %v420_v40 = vadd.f32 %v419_v39, %v377_v33  ;;  %v492_v41 = vpop.f32.mrb[9].mxu1 }
 0x569   :  { %v422_v42 = vpop.f32.mrb[10].mxu1 }
 0x56a   :  { %v430_v43 = vadd.f32 %v429_v38, %v420_v40  ;;  %v423_v44 = vadd.f32 %v422_v42, %v381_v36  ;;  %v493_v45 = vpop.f32.mrb[11].mxu1 }
 0x56c   :  { %v468_v46 = vmul.f32 -1.442695, %v430_v43  ;;  %v431_v47 = vadd.f32 %v429_v38, %v423_v44 }
 0x56e   :  { %514 = vpow2.f32 %v468_v46  ;;  %v469_v48 = vmul.f32 -1.442695, %v431_v47 }
 0x570   :  { %516 = vpow2.f32 %v469_v48 }
 0x578   :  { %v515_v49 = vpop.eup %514 }
 0x579   :  { %v438_v50 = vadd.f32 1.0, %v515_v49 }
 0x57a   :  { %v517_v51 = vpop.eup %516 }
 0x57b   :  { %518 = vrcp.f32 %v438_v50  ;;  %v439_v14 = vadd.f32 1.0, %v517_v51 }
 0x57d   :  { %520 = vrcp.f32 %v439_v14 }
 0x585   :  { %v519_v20 = vpop.eup %518 }
 0x586   :  { %445 = vst.msk [vmem:[%s651_s4] sm:$0xff] %vm444_vm5, %v519_v20 }
 0x587   :  { %v521_v22 = vpop.eup %520 }
 0x588   :  { %446 = vst.msk [vmem:[%s651_s4 + $0x8] sm:$0xff] %vm444_vm5, %v521_v22 }
 0x589   :  { %451 = vsyncpa [#allocation3], 1 }

</bundles_post_ra>
